<compile_context>
chip_gen: v6e
topology: v6e:2x2x1
jax: 0.10.0
libtpu: 0.0.40
codegen_flags: <defaults>
</compile_context>

<pallas_src>
import functools

import jax
import jax.numpy as jnp
from jax.experimental import pallas as pl
from jax.experimental.pallas import tpu as pltpu


def _round_up(n, m):
    return ((n + m - 1) // m) * m


# ----------------------------- Pallas kernel ------------------------------- #

def _fused_outputpp_kernel(rbf_ref, x_ref, w_rbf_ref, w_up_ref, w_l_ref,
                           b_l_ref, w_out_ref, o_ref, *, num_layers,
                           compute_dtype):
    """One edge tile: rbf gate + all output branches (block-diagonal fused)."""
    # Stage 1: rbf projection (MXU, f32 accumulation) + elementwise gate.
    # Gate stays f32 on the VPU (v5e has no bf16 VPU); x is upcast exactly once.
    proj = jnp.dot(rbf_ref[...], w_rbf_ref[...],
                   preferred_element_type=jnp.float32)          # [te, H] f32
    xg = proj * x_ref[...].astype(jnp.float32)                  # [te, H] f32

    # Stage 2: fused branches. Branch weights are packed so the activation h is
    # [te, A*O] (= 128 lanes for the default config, native MXU width).
    h = jnp.dot(xg.astype(compute_dtype), w_up_ref[...],
                preferred_element_type=jnp.float32)             # [te, A*O] f32
    for l in range(num_layers):          # static unroll (compile-time constant)
        h = jnp.dot(h.astype(compute_dtype), w_l_ref[l],
                    preferred_element_type=jnp.float32) + b_l_ref[l]
        h = h * jax.nn.sigmoid(h)        # SiLU / swish, f32 on the VPU/EUP
    # Final projection into the exact-width (C_total-lane) output slab.
    o_ref[...] = jnp.dot(h.astype(compute_dtype), w_out_ref[...],
                         preferred_element_type=jnp.float32).astype(o_ref.dtype)


# ----------------------------- Param packing ------------------------------- #

def _pack_params(params, compute_dtype):
    """Concatenate / block-diagonalize per-branch weights into lane-dense slabs."""
    w_ups = params["w_up"]            # list of [H, O]
    w_ls = params["w_layers"]         # list of [L, O, O]
    b_ls = params["b_layers"]         # list of [L, 1, O]
    w_outs = params["w_out"]          # list of [O, C_a]

    A = len(w_ups)
    H, O = w_ups[0].shape
    L = w_ls[0].shape[0]
    AO = A * O
    c_sizes = [w.shape[1] for w in w_outs]
    C_total = sum(c_sizes)            # exact output width (no 128-lane padding)

    w_up_cat = jnp.concatenate(w_ups, axis=1)                      # [H, AO]

    w_l_bd = jnp.zeros((L, AO, AO), jnp.float32)                   # block diag
    b_l_cat = jnp.zeros((L, 1, AO), jnp.float32)
    for a in range(A):
        sl = slice(a * O, (a + 1) * O)
        w_l_bd = w_l_bd.at[:, sl, sl].set(w_ls[a])
        b_l_cat = b_l_cat.at[:, :, sl].set(b_ls[a])

    w_out_pack = jnp.zeros((AO, C_total), jnp.float32)
    offsets = []
    off = 0
    for a in range(A):
        offsets.append(off)
        w_out_pack = w_out_pack.at[a * O:(a + 1) * O,
                                   off:off + c_sizes[a]].set(w_outs[a])
        off += c_sizes[a]

    packed = {
        "w_rbf": params["w_rbf"].astype(compute_dtype),            # [R, H]
        "w_up": w_up_cat.astype(compute_dtype),                    # [H, AO]
        "w_l": w_l_bd.astype(compute_dtype),                       # [L, AO, AO]
        "b_l": b_l_cat,                                            # f32 bias
        "w_out": w_out_pack.astype(compute_dtype),                 # [AO, C_total]
    }
    return packed, offsets, c_sizes, C_total, L, AO


# ------------------------------- Wrapper ----------------------------------- #

def output_pp_block_forward(x, rbf, i, params, *, num_nodes=None, bt=None,
                            alpha=1.0, compute_dtype=jnp.bfloat16,
                            tile_e=1024):
    """Fused OutputPPBlock forward. Returns [out_0, ..., out_num_aux]."""
    del i, num_nodes, bt, alpha   # x_spe is computed-but-unused in the module.

    E, H = x.shape
    R = rbf.shape[1]
    out_dtype = x.dtype

    packed, offsets, c_sizes, C_total, L, AO = _pack_params(params,
                                                            compute_dtype)

    # Edge tiling:
    #  * te multiple of 16 (bf16 sublane packing; also satisfies f32's 8),
    #  * sized so the grid has >= 2 steps when E allows it (v7x megacore can
    #    only shard grid steps, never a single step),
    #  * capped at tile_e (amortizes per-step overhead; VMEM is never tight).
    te_cap = max(16, _round_up(min(tile_e, E), 16))
    te = min(te_cap, max(16, _round_up(pl.cdiv(E, 2), 16)))
    E_pad = _round_up(E, te)

    if E_pad != E:
        pad = E_pad - E
        x_p = jnp.pad(x, ((0, pad), (0, 0)))
        rbf_p = jnp.pad(rbf, ((0, pad), (0, 0)))
    else:
        x_p, rbf_p = x, rbf
    # Cast inputs once in the wrapper: halves input DMA bytes / VMEM tiles in
    # the bf16 path and removes per-tile casts inside the kernel.
    x_p = x_p.astype(compute_dtype)
    rbf_p = rbf_p.astype(compute_dtype)

    weight_bytes = sum(int(v.size) * v.dtype.itemsize for v in packed.values())
    cost = pl.CostEstimate(
        flops=2 * E_pad * (R * H + H * AO + L * AO * AO + AO * C_total),
        transcendentals=E_pad * AO * L,                 # sigmoid in SiLU
        bytes_accessed=int(rbf_p.size) * rbf_p.dtype.itemsize
                       + int(x_p.size) * x_p.dtype.itemsize
                       + E_pad * C_total * jnp.dtype(out_dtype).itemsize
                       + weight_bytes)

    # Weight BlockSpecs have constant index_maps -> fetched once, revisited
    # across all edge tiles (no per-step re-DMA).
    out_slab = pl.pallas_call(
        functools.partial(_fused_outputpp_kernel, num_layers=L,
                          compute_dtype=compute_dtype),
        out_shape=jax.ShapeDtypeStruct((E_pad, C_total), out_dtype),
        grid=(E_pad // te,),
        in_specs=[
            pl.BlockSpec((te, R), lambda e: (e, 0)),          # rbf tile
            pl.BlockSpec((te, H), lambda e: (e, 0)),          # x tile
            pl.BlockSpec((R, H), lambda e: (0, 0)),           # W_rbf (resident)
            pl.BlockSpec((H, AO), lambda e: (0, 0)),          # W_up (cat)
            pl.BlockSpec((L, AO, AO), lambda e: (0, 0, 0)),   # W_layers (blkdiag)
            pl.BlockSpec((L, 1, AO), lambda e: (0, 0, 0)),    # biases (cat)
            pl.BlockSpec((AO, C_total), lambda e: (0, 0)),    # W_out (packed)
        ],
        out_specs=pl.BlockSpec((te, C_total), lambda e: (e, 0)),
        compiler_params=pltpu.CompilerParams(
            dimension_semantics=("parallel",)),   # shard edge tiles across TCs
        cost_estimate=cost,
    )(rbf_p, x_p, packed["w_rbf"], packed["w_up"], packed["w_l"],
      packed["b_l"], packed["w_out"])

    # Exact-width slab: drop the pad rows once, then cheap column splits.
    out_valid = out_slab[:E]
    return [out_valid[:, off:off + c] for off, c in zip(offsets, c_sizes)]


# ------------------------- Pure-JAX reference check ------------------------ #

def _reference_forward(x, rbf, params):
    xg = (rbf @ params["w_rbf"]) * x
    outs = []
    for a in range(len(params["w_up"])):
        h = xg @ params["w_up"][a]
        for l in range(params["w_layers"][a].shape[0]):
            h = h @ params["w_layers"][a][l] + params["b_layers"][a][l]
            h = h * jax.nn.sigmoid(h)
        outs.append(h @ params["w_out"][a])
    return outs


# ----------------------------------- Main ----------------------------------- #

if __name__ == "__main__":
    # Module hyperparameters (small, TPU-friendly; A*O = 2*64 = 128 lanes).
    num_radial = 8          # R
    hidden_channels = 32    # H
    out_emb_channels = 64   # O
    out_channels = 16       # C (primary head)
    num_layers = 2          # L
    num_aux = 1
    aux_output_channels = [16]
    E = 100                 # edges / triplets (not a multiple of 16: pad path)
    num_nodes = 16

    out_chs = [out_channels] + aux_output_channels

    key = jax.random.PRNGKey(0)
    keys = iter(jax.random.split(key, 64))

    def rnd(shape, scale=0.1):
        return scale * jax.random.normal(next(keys), shape, dtype=jnp.float32)

    # Deterministic synthetic parameters (shapes match the PyTorch module;
    # weights stored pre-transposed as [in, out]).
    params = {
        "w_rbf": rnd((num_radial, hidden_channels)),
        "w_up": [rnd((hidden_channels, out_emb_channels))
                 for _ in range(num_aux + 1)],
        "w_layers": [rnd((num_layers, out_emb_channels, out_emb_channels))
                     for _ in range(num_aux + 1)],
        "b_layers": [rnd((num_layers, 1, out_emb_channels))
                     for _ in range(num_aux + 1)],
        "w_out": [rnd((out_emb_channels, out_chs[a]))
                  for a in range(num_aux + 1)],
    }

    # Inputs.
    x = rnd((E, hidden_channels), scale=1.0)
    rbf = rnd((E, num_radial), scale=1.0)
    i = jax.random.randint(next(keys), (E,), 0, num_nodes, dtype=jnp.int32)

    refs = _reference_forward(x, rbf, params)

    # Default path: bf16 MXU operands, f32 accumulation + f32 gate/SiLU.
    fwd_bf16 = jax.jit(functools.partial(
        output_pp_block_forward, num_nodes=num_nodes))
    outs_bf16 = jax.block_until_ready(fwd_bf16(x, rbf, i, params))
    for o, r in zip(outs_bf16, refs):
        assert o.shape == r.shape
        assert jnp.allclose(o, r, atol=2e-2, rtol=1e-1), \
            "bf16-operand path drifts too far from reference"

    # Full-f32 operand path: bit-for-bit-ish parity with the pure-JAX reference.
    fwd_f32 = jax.jit(functools.partial(
        output_pp_block_forward, num_nodes=num_nodes,
        compute_dtype=jnp.float32))
    outs_f32 = jax.block_until_ready(fwd_f32(x, rbf, i, params))
    for o, r in zip(outs_f32, refs):
        assert o.shape == r.shape
        assert jnp.allclose(o, r, atol=1e-3, rtol=1e-2), "f32 mismatch vs reference"

    print("KERNEL_OK")
</pallas_src>

<mosaic_0001>
module attributes {stable_mosaic.version = 11 : i64} {
  func.func @_fused_outputpp_kernel(%arg0: i32, %arg1: memref<64x8xbf16, #tpu.memory_space<vmem>>, %arg2: memref<64x32xbf16, #tpu.memory_space<vmem>>, %arg3: memref<8x32xbf16, #tpu.memory_space<vmem>>, %arg4: memref<32x128xbf16, #tpu.memory_space<vmem>>, %arg5: memref<2x128x128xbf16, #tpu.memory_space<vmem>>, %arg6: memref<2x1x128xf32, #tpu.memory_space<vmem>>, %arg7: memref<128x32xbf16, #tpu.memory_space<vmem>>, %arg8: memref<64x32xf32, #tpu.memory_space<vmem>>) attributes {dimension_semantics = [#tpu.dimension_semantics<parallel>], iteration_bounds = array<i64: 2>, scalar_prefetch = 0 : i64, scratch_operands = 0 : i64, tpu.core_type = #tpu.core_type<tc>, window_params = [{transform_indices = @transform_0, window_bounds = array<i64: 64, 8>}, {transform_indices = @transform_1, window_bounds = array<i64: 64, 32>}, {pipeline_mode = #tpu.pipeline_mode<synchronous>, transform_indices = @transform_2, window_bounds = array<i64: 8, 32>}, {pipeline_mode = #tpu.pipeline_mode<synchronous>, transform_indices = @transform_3, window_bounds = array<i64: 32, 128>}, {pipeline_mode = #tpu.pipeline_mode<synchronous>, transform_indices = @transform_4, window_bounds = array<i64: 2, 128, 128>}, {pipeline_mode = #tpu.pipeline_mode<synchronous>, transform_indices = @transform_5, window_bounds = array<i64: 2, 1, 128>}, {pipeline_mode = #tpu.pipeline_mode<synchronous>, transform_indices = @transform_6, window_bounds = array<i64: 128, 32>}, {transform_indices = @transform_7, window_bounds = array<i64: 64, 32>}]} {
    %c0 = arith.constant 0 : index
    %c0_0 = arith.constant 0 : index
    %0 = vector.load %arg1[%c0, %c0_0] : memref<64x8xbf16, #tpu.memory_space<vmem>>, vector<64x8xbf16>
    %c0_1 = arith.constant 0 : index
    %c0_2 = arith.constant 0 : index
    %1 = vector.load %arg3[%c0_1, %c0_2] : memref<8x32xbf16, #tpu.memory_space<vmem>>, vector<8x32xbf16>
    %cst = arith.constant dense<0.000000e+00> : vector<64x32xf32>
    %2 = tpu.matmul %0, %1, %cst {dimension_numbers = #tpu.dot_dimension_numbers<[1], [0], [0], [1], [0, 0, 1, 1], [], []>} : vector<64x8xbf16>, vector<8x32xbf16>, vector<64x32xf32> -> vector<64x32xf32>
    %c0_3 = arith.constant 0 : index
    %c0_4 = arith.constant 0 : index
    %3 = vector.load %arg2[%c0_3, %c0_4] : memref<64x32xbf16, #tpu.memory_space<vmem>>, vector<64x32xbf16>
    %4 = arith.extf %3 : vector<64x32xbf16> to vector<64x32xf32>
    %5 = arith.mulf %2, %4 : vector<64x32xf32>
    %6 = arith.truncf %5 : vector<64x32xf32> to vector<64x32xbf16>
    %c0_5 = arith.constant 0 : index
    %c0_6 = arith.constant 0 : index
    %7 = vector.load %arg4[%c0_5, %c0_6] : memref<32x128xbf16, #tpu.memory_space<vmem>>, vector<32x128xbf16>
    %cst_7 = arith.constant dense<0.000000e+00> : vector<64x128xf32>
    %8 = tpu.matmul %6, %7, %cst_7 {dimension_numbers = #tpu.dot_dimension_numbers<[1], [0], [0], [1], [0, 0, 1, 1], [], []>} : vector<64x32xbf16>, vector<32x128xbf16>, vector<64x128xf32> -> vector<64x128xf32>
    %9 = arith.truncf %8 : vector<64x128xf32> to vector<64x128xbf16>
    %c0_8 = arith.constant 0 : index
    %c0_9 = arith.constant 0 : index
    %c0_10 = arith.constant 0 : index
    %10 = vector.load %arg5[%c0_8, %c0_9, %c0_10] : memref<2x128x128xbf16, #tpu.memory_space<vmem>>, vector<1x128x128xbf16>
    %11 = vector.shape_cast %10 : vector<1x128x128xbf16> to vector<128x128xbf16>
    %cst_11 = arith.constant dense<0.000000e+00> : vector<64x128xf32>
    %12 = tpu.matmul %9, %11, %cst_11 {dimension_numbers = #tpu.dot_dimension_numbers<[1], [0], [0], [1], [0, 0, 1, 1], [], []>} : vector<64x128xbf16>, vector<128x128xbf16>, vector<64x128xf32> -> vector<64x128xf32>
    %c0_12 = arith.constant 0 : index
    %c0_13 = arith.constant 0 : index
    %c0_14 = arith.constant 0 : index
    %13 = vector.load %arg6[%c0_12, %c0_13, %c0_14] : memref<2x1x128xf32, #tpu.memory_space<vmem>>, vector<1x1x128xf32>
    %14 = vector.shape_cast %13 : vector<1x1x128xf32> to vector<1x128xf32>
    %15 = vector.broadcast %14 : vector<1x128xf32> to vector<64x128xf32>
    %16 = arith.addf %12, %15 : vector<64x128xf32>
    %17 = arith.negf %16 : vector<64x128xf32>
    %18 = math.exp %17 : vector<64x128xf32>
    %cst_15 = arith.constant 1.000000e+00 : f32
    %19 = vector.broadcast %cst_15 : f32 to vector<64x128xf32>
    %20 = arith.addf %19, %18 : vector<64x128xf32>
    %21 = arith.divf %19, %20 : vector<64x128xf32>
    %22 = arith.mulf %16, %21 : vector<64x128xf32>
    %23 = arith.truncf %22 : vector<64x128xf32> to vector<64x128xbf16>
    %c1 = arith.constant 1 : index
    %c0_16 = arith.constant 0 : index
    %c0_17 = arith.constant 0 : index
    %24 = vector.load %arg5[%c1, %c0_16, %c0_17] : memref<2x128x128xbf16, #tpu.memory_space<vmem>>, vector<1x128x128xbf16>
    %25 = vector.shape_cast %24 : vector<1x128x128xbf16> to vector<128x128xbf16>
    %cst_18 = arith.constant dense<0.000000e+00> : vector<64x128xf32>
    %26 = tpu.matmul %23, %25, %cst_18 {dimension_numbers = #tpu.dot_dimension_numbers<[1], [0], [0], [1], [0, 0, 1, 1], [], []>} : vector<64x128xbf16>, vector<128x128xbf16>, vector<64x128xf32> -> vector<64x128xf32>
    %c1_19 = arith.constant 1 : index
    %c0_20 = arith.constant 0 : index
    %c0_21 = arith.constant 0 : index
    %27 = vector.load %arg6[%c1_19, %c0_20, %c0_21] : memref<2x1x128xf32, #tpu.memory_space<vmem>>, vector<1x1x128xf32>
    %28 = vector.shape_cast %27 : vector<1x1x128xf32> to vector<1x128xf32>
    %29 = vector.broadcast %28 : vector<1x128xf32> to vector<64x128xf32>
    %30 = arith.addf %26, %29 : vector<64x128xf32>
    %31 = arith.negf %30 : vector<64x128xf32>
    %32 = math.exp %31 : vector<64x128xf32>
    %cst_22 = arith.constant 1.000000e+00 : f32
    %33 = vector.broadcast %cst_22 : f32 to vector<64x128xf32>
    %34 = arith.addf %33, %32 : vector<64x128xf32>
    %35 = arith.divf %33, %34 : vector<64x128xf32>
    %36 = arith.mulf %30, %35 : vector<64x128xf32>
    %37 = arith.truncf %36 : vector<64x128xf32> to vector<64x128xbf16>
    %c0_23 = arith.constant 0 : index
    %c0_24 = arith.constant 0 : index
    %38 = vector.load %arg7[%c0_23, %c0_24] : memref<128x32xbf16, #tpu.memory_space<vmem>>, vector<128x32xbf16>
    %cst_25 = arith.constant dense<0.000000e+00> : vector<64x32xf32>
    %39 = tpu.matmul %37, %38, %cst_25 {dimension_numbers = #tpu.dot_dimension_numbers<[1], [0], [0], [1], [0, 0, 1, 1], [], []>} : vector<64x128xbf16>, vector<128x32xbf16>, vector<64x32xf32> -> vector<64x32xf32>
    %c0_26 = arith.constant 0 : index
    %c0_27 = arith.constant 0 : index
    %40 = vector.load %arg8[%c0_26, %c0_27] : memref<64x32xf32, #tpu.memory_space<vmem>>, vector<64x32xf32>
    tpu.vector_store %arg8[%c0_26, %c0_27], %39 {strides = array<i32>} : memref<64x32xf32, #tpu.memory_space<vmem>>, vector<64x32xf32>,
    return
  }
  func.func @transform_0(%arg0: i32) -> (i32, i32) {
    %c0_i32 = arith.constant 0 : i32
    %c0_i32_0 = arith.constant 0 : i32
    return %arg0, %c0_i32 : i32, i32
  }
  func.func @transform_1(%arg0: i32) -> (i32, i32) {
    %c0_i32 = arith.constant 0 : i32
    %c0_i32_0 = arith.constant 0 : i32
    return %arg0, %c0_i32 : i32, i32
  }
  func.func @transform_2(%arg0: i32) -> (i32, i32) {
    %c0_i32 = arith.constant 0 : i32
    %c0_i32_0 = arith.constant 0 : i32
    %c0_i32_1 = arith.constant 0 : i32
    return %c0_i32, %c0_i32_0 : i32, i32
  }
  func.func @transform_3(%arg0: i32) -> (i32, i32) {
    %c0_i32 = arith.constant 0 : i32
    %c0_i32_0 = arith.constant 0 : i32
    %c0_i32_1 = arith.constant 0 : i32
    return %c0_i32, %c0_i32_0 : i32, i32
  }
  func.func @transform_4(%arg0: i32) -> (i32, i32, i32) {
    %c0_i32 = arith.constant 0 : i32
    %c0_i32_0 = arith.constant 0 : i32
    %c0_i32_1 = arith.constant 0 : i32
    %c0_i32_2 = arith.constant 0 : i32
    return %c0_i32, %c0_i32_0, %c0_i32_1 : i32, i32, i32
  }
  func.func @transform_5(%arg0: i32) -> (i32, i32, i32) {
    %c0_i32 = arith.constant 0 : i32
    %c0_i32_0 = arith.constant 0 : i32
    %c0_i32_1 = arith.constant 0 : i32
    %c0_i32_2 = arith.constant 0 : i32
    return %c0_i32, %c0_i32_0, %c0_i32_1 : i32, i32, i32
  }
  func.func @transform_6(%arg0: i32) -> (i32, i32) {
    %c0_i32 = arith.constant 0 : i32
    %c0_i32_0 = arith.constant 0 : i32
    %c0_i32_1 = arith.constant 0 : i32
    return %c0_i32, %c0_i32_0 : i32, i32
  }
  func.func @transform_7(%arg0: i32) -> (i32, i32) {
    %c0_i32 = arith.constant 0 : i32
    %c0_i32_0 = arith.constant 0 : i32
    return %arg0, %c0_i32 : i32, i32
  }
}

</mosaic_0001>

<bundles_post_ra>
// kernel: output_pp_block_forward.1
= control target key start
LH: loop header
LB: loop body
LE: loop exit
PB: predicated region body
PF: predicated region fallthrough
CT: control target
= control target key end

     0   :  { %s1538_s24 = smov 0   ;;  %s1665_s0 = inlined_call_operand.vmem [shape: bf16[128,8], index: 0, kind: input, shape index: {}]   ;;  %s1666_s1 = inlined_call_operand.vmem [shape: bf16[128,32], index: 1, kind: input, shape index: {}]   ;;  %s1667_s2 = inlined_call_operand.vmem [shape: bf16[8,32], index: 2, kind: input, shape index: {}]   ;;  %s1668_s3 = inlined_call_operand.vmem [shape: bf16[32,128], index: 3, kind: input, shape index: {}]   ;;  %s1669_s4 = inlined_call_operand.vmem [shape: bf16[2,128,128], index: 4, kind: input, shape index: {}]   ;;  %s1670_s5 = inlined_call_operand.vmem [shape: f32[2,1,128], index: 5, kind: input, shape index: {}]   ;;  %s1671_s6 = inlined_call_operand.vmem [shape: bf16[128,32], index: 6, kind: input, shape index: {}]   ;;  %s1672_s7 = inlined_call_operand.vmem [shape: f32[128,32], index: 7, kind: output, shape index: {}]  }
   0x1 LB: > { %s1141_s25 = sadd.s32 4294967295, %s1496_s24   ;;  %p1145_p0 = scmp.ge.s32.totalorder %s1496_s24, 1  ;;  %s1496_s24 = sphi %s1538_s24, %s17_s24  }
   0x2   : > { %p249_p1 = scmp.lt.s32.totalorder %s1496_s24, 3 }
   0x4   : > { %p250_p2 = pnand %p1145_p0, %p249_p1 }
   0x5   : > { %s1146_s28 = sshll.u32 (!%p250_p2), %s1141_s25, 3 }
   0x6   : > { %253 = sbr.rel (%p250_p2) target bundleno = 1106 (0x452), region = 48  ;;  %p287_p3 = scmp.lt.s32.totalorder (!%p250_p2), %s1146_s28, 15 }
   0xb   : > { %v313_v0 = vld [vmem:[%s1667_s2] sm:$0xf]  ;;  %vm347_vm0 = vcmask 1043456   ;;  %v1400_v1 = vld [vmem:[%s1668_s3 + $0x8] sm:$0xff]   ;;  %s1674_s28 = smov (!%p287_p3, %s1146_s28), 15  ;;  %vm334_vm1 = vcmask 64512  }
   0xc   : > { %1387 = vmatprep.subr.msk.bf16.mxu1 %vm347_vm0, %v313_v0  ;;  %v349_v2 = vsel %vm347_vm0, %v313_v0, 0  ;;  %s1147_s8 = sshll.u32 %s1674_s28, 2  ;;  %v1401_v7 = vld [vmem:[%s1668_s3] sm:$0xff]   ;;  %v1402_v8 = vld [vmem:[%s1669_s4 + $0x38] sm:$0xff]   ;;  %v1403_v9 = vld [vmem:[%s1669_s4 + $0x30] sm:$0xff]   ;;  %vm460_vm2 = vcmask 261120  }
   0xd   : > { %1294 = vmatpush3.bf16.msra.mxu1 %v349_v2  ;;  %s290_s11 = scalar_lea.vmem %s1665_s0, %s1147_s8  ;;  %1315 = vmatprep.subr.bf16.mxu0 %v1402_v8  ;;  %v1404_v10 = vld [vmem:[%s1669_s4 + $0x28] sm:$0xff]   ;;  %v1405_v11 = vld [vmem:[%s1669_s4 + $0x20] sm:$0xff]   ;;  %v1406_v12 = vld [vmem:[%s1669_s4 + $0x18] sm:$0xff]   ;;  %s296_s30 = scalar_lea.vmem %s1666_s1, %s1147_s8 }
   0xe   : > { %1303 = vmatprep.subr.bf16.mxu1 %v1400_v1  ;;  %v1396_v3 = vld [vmem:[%s290_s11] sm:$0xff]   ;;  %v1397_v4 = vld [vmem:[%s290_s11 + $0x8] sm:$0xff]   ;;  %v1398_v5 = vld [vmem:[%s290_s11 + $0x10] sm:$0xff]   ;;  %1316 = vmatpush3.bf16.msra.mxu0 %v1402_v8  ;;  %s1151_s29 = sshll.u32 %s1674_s28, 3 }
   0xf   : > { %1295 = vmatprep.mubr.msk.bf16.mxu1 %vm334_vm1, %v1396_v3  ;;  %v1399_v6 = vld [vmem:[%s290_s11 + $0x18] sm:$0xff]   ;;  %1317 = vmatprep.subr.bf16.mxu0 %v1403_v9  ;;  %v1407_v13 = vld [vmem:[%s1669_s4 + $0x10] sm:$0xff]   ;;  %v1228_v15 = vld [vmem:[%s296_s30] sm:$0xff]   ;;  %s302_s9 = scalar_lea.vmem %s1672_s7, %s1151_s29 }
  0x10   : > { %1296 = vmatmul.mubr.msk.bf16.vlgmr.msra.gmra.mxu1 %vm334_vm1, %v1397_v4  ;;  %v1243_v16 = vld [vmem:[%s296_s30 + $0x8] sm:$0xff]   ;;  %v1229_v19 = vunpack.c.l.bf16 %v1228_v15  ;;  %v1230_v20 = vunpack.c.h.bf16 %v1228_v15  ;;  %v1244_v29 = vld [vmem:[%s296_s30 + $0x10] sm:$0xff]   ;;  %v1245_v31 = vld [vmem:[%s296_s30 + $0x18] sm:$0xff]  }
  0x11   : > { %1299 = vmatprep.mubr.msk.bf16.mxu1 %vm334_vm1, %v1398_v5  ;;  %1304 = vmatpush3.bf16.msra.mxu1 %v1400_v1  ;;  %v1234_v18 = vunpack.c.h.bf16 %v1243_v16  ;;  %v1233_v21 = vunpack.c.l.bf16 %v1243_v16  ;;  %v1242_v34 = vunpack.c.h.bf16 %v1245_v31  ;;  %v1237_v35 = vunpack.c.l.bf16 %v1244_v29  ;;  %v1408_v46 = vld [vmem:[%s1669_s4 + $0x8] sm:$0xff]   ;;  %v1409_v47 = vld [vmem:[%s1669_s4] sm:$0xff]   ;;  %v1410_v60 = vld [vmem:[%s1669_s4 + $0x78] sm:$0xff]  }
  0x12   : > { %1305 = vmatprep.subr.bf16.mxu1 %v1401_v7  ;;  %1318 = vmatpush3.bf16.msra.mxu0 %v1403_v9  ;;  %v1238_v36 = vunpack.c.h.bf16 %v1244_v29  ;;  %v1241_v37 = vunpack.c.l.bf16 %v1245_v31  ;;  %v1411_v61 = vld [vmem:[%s1669_s4 + $0x70] sm:$0xff]   ;;  %v1412_v62 = vld [vmem:[%s1669_s4 + $0x68] sm:$0xff]   ;;  %v1413_v63 = vld [vmem:[%s1669_s4 + $0x60] sm:$0xff]  }
  0x13   : > { %1319 = vmatprep.subr.bf16.mxu0 %v1404_v10  ;;  %v1414_v0 = vld [vmem:[%s1669_s4 + $0x58] sm:$0xff]   ;;  %v1415_v1 = vld [vmem:[%s1669_s4 + $0x50] sm:$0xff]   ;;  %v1416_v2 = vld [vmem:[%s1669_s4 + $0x48] sm:$0xff]  }
  0x14   : > { %v1417_v3 = vld [vmem:[%s1669_s4 + $0x40] sm:$0xff]  }
  0x15   : > { %1306 = vmatpush3.bf16.msra.mxu1 %v1401_v7  ;;  %v1166_v4 = vld [vmem:[%s1670_s5] ss:$0 sm:$0xff] }
  0x16   : > { %1320 = vmatpush3.bf16.msra.mxu0 %v1404_v10  ;;  %1339 = vmatprep.subr.bf16.mxu1 %v1410_v60 }
  0x17   : > { %1321 = vmatprep.subr.bf16.mxu0 %v1405_v11 }
  0x18   : > { %1300 = vmatmul.mubr.msk.bf16.gmra.mxu1 %vm334_vm1, %v1399_v6 }
  0x1a   : > { %1322 = vmatpush3.bf16.msra.mxu0 %v1405_v11 }
  0x1b   : > { %1323 = vmatprep.subr.bf16.mxu0 %v1406_v12 }
  0x1e   : > { %1324 = vmatpush3.bf16.msra.mxu0 %v1406_v12 }
  0x1f   : > { %1325 = vmatprep.subr.bf16.mxu0 %v1407_v13 }
  0x22   : > { %1326 = vmatpush3.bf16.msra.mxu0 %v1407_v13 }
  0x23   : > { %1327 = vmatprep.subr.bf16.mxu0 %v1408_v46 }
  0x26   : > { %1328 = vmatpush3.bf16.msra.mxu0 %v1408_v46 }
  0x27   : > { %1329 = vmatprep.subr.bf16.mxu0 %v1409_v47 }
  0x2a   : > { %1330 = vmatpush3.bf16.msra.mxu0 %v1409_v47 }
  0xd0   : > { %v1297_v14 = vpop.f32.mrf.mxu1 }
  0xd1   : > { %v434_v27 = vmul.f32 %v1297_v14, %v1233_v21 }
  0xd2   : > { %v385_v17 = vpop.f32.mrf.mxu1 }
  0xd3   : > { %v432_v25 = vmul.f32 %v1229_v19, %v385_v17 }
  0xd4   : > { %v1298_v22 = vpop.f32.mrf.mxu1 }
  0xd5   : > { %v435_v23 = vmul.f32 %v1298_v22, %v1234_v18 }
  0xd6   : > { %v388_v24 = vpop.f32.mrf.mxu1 }
  0xd7   : > { %v433_v26 = vmul.f32 %v1230_v20, %v388_v24  ;;  %v441_v32 = vpack.c.bf16 %v435_v23, %v434_v27 }
  0xd8   : > { %v1301_v28 = vpop.f32.mrf.mxu1 }
  0xd9   : > { %v440_v30 = vpack.c.bf16 %v433_v26, %v432_v25  ;;  %v438_v43 = vmul.f32 %v1301_v28, %v1241_v37 }
  0xda   : > { %v401_v33 = vpop.f32.mrf.mxu1 }
  0xdb   : > { %1307 = vmatprep.mubr.msk.bf16.mxu1 %vm460_vm2, %v440_v30  ;;  %v436_v41 = vmul.f32 %v1237_v35, %v401_v33 }
  0xdc   : > { %v1302_v38 = vpop.f32.mrf.mxu1  ;;  %1308 = vmatmul.mubr.msk.bf16.vlgmr.msra.gmra.mxu1 %vm460_vm2, %v441_v32 }
  0xdd   : > { %v439_v39 = vmul.f32 %v1302_v38, %v1242_v34  ;;  %1340 = vmatpush3.bf16.msra.mxu1 %v1410_v60 }
  0xde   : > { %v404_v40 = vpop.f32.mrf.mxu1  ;;  %1341 = vmatprep.subr.bf16.mxu1 %v1411_v61 }
  0xdf   : > { %v437_v42 = vmul.f32 %v1238_v36, %v404_v40  ;;  %v443_v45 = vpack.c.bf16 %v439_v39, %v438_v43 }
  0xe1   : > { %v442_v44 = vpack.c.bf16 %v437_v42, %v436_v41  ;;  %1342 = vmatpush3.bf16.msra.mxu1 %v1411_v61 }
  0xe2   : > { %1343 = vmatprep.subr.bf16.mxu1 %v1412_v62 }
  0xe3   : > { %1311 = vmatprep.mubr.msk.bf16.mxu1 %vm460_vm2, %v442_v44 }
  0xe4   : > { %1312 = vmatmul.mubr.msk.bf16.gmra.mxu1 %vm460_vm2, %v443_v45 }
  0xe5   : > { %1344 = vmatpush3.bf16.msra.mxu1 %v1412_v62 }
  0xe6   : > { %1345 = vmatprep.subr.bf16.mxu1 %v1413_v63 }
  0xe9   : > { %1346 = vmatpush3.bf16.msra.mxu1 %v1413_v63 }
  0xea   : > { %1347 = vmatprep.subr.bf16.mxu1 %v1414_v0 }
  0xed   : > { %1348 = vmatpush3.bf16.msra.mxu1 %v1414_v0 }
  0xee   : > { %1349 = vmatprep.subr.bf16.mxu1 %v1415_v1 }
  0xf1   : > { %1350 = vmatpush3.bf16.msra.mxu1 %v1415_v1  ;;  %v1418_v1 = vld [vmem:[%s1671_s6 + $0x38] sm:$0xff]  }
  0xf2   : > { %1351 = vmatprep.subr.bf16.mxu1 %v1416_v2  ;;  %1363 = vmatprep.subr.bf16.mxu0 %v1418_v1 }
  0xf5   : > { %1352 = vmatpush3.bf16.msra.mxu1 %v1416_v2  ;;  %v1419_v2 = vld [vmem:[%s1671_s6 + $0x30] sm:$0xff]  }
  0xf6   : > { %1353 = vmatprep.subr.bf16.mxu1 %v1417_v3 }
  0xf9   : > { %1354 = vmatpush3.bf16.msra.mxu1 %v1417_v3  ;;  %v1420_v3 = vld [vmem:[%s1671_s6 + $0x28] sm:$0xff]  }
 0x19c   : > { %v1309_v48 = vpop.f32.mrf.mxu1 }
 0x19e   : > { %v507_v49 = vpop.f32.mrf.mxu1 }
 0x1a0   : > { %v1310_v50 = vpop.f32.mrf.mxu1 }
 0x1a1   : > { %v539_v53 = vpack.c.bf16 %v1310_v50, %v1309_v48 }
 0x1a2   : > { %v510_v51 = vpop.f32.mrf.mxu1 }
 0x1a3   : > { %v538_v52 = vpack.c.bf16 %v510_v51, %v507_v49 }
 0x1a4   : > { %v1313_v54 = vpop.f32.mrf.mxu1 }
 0x1a5   : > { %1331 = vmatprep.mubr.bf16.mxu0 %v538_v52 }
 0x1a6   : > { %v523_v55 = vpop.f32.mrf.mxu1  ;;  %1332 = vmatmul.mubr.bf16.vlgmr.msra.gmra.mxu0 %v539_v53 }
 0x1a7   : > { %1364 = vmatpush3.bf16.msra.mxu0 %v1418_v1 }
 0x1a8   : > { %v1314_v56 = vpop.f32.mrf.mxu1  ;;  %1365 = vmatprep.subr.bf16.mxu0 %v1419_v2 }
 0x1a9   : > { %v541_v59 = vpack.c.bf16 %v1314_v56, %v1313_v54 }
 0x1aa   : > { %v526_v57 = vpop.f32.mrf.mxu1 }
 0x1ab   : > { %v540_v58 = vpack.c.bf16 %v526_v57, %v523_v55  ;;  %1366 = vmatpush3.bf16.msra.mxu0 %v1419_v2 }
 0x1ac   : > { %1367 = vmatprep.subr.bf16.mxu0 %v1420_v3 }
 0x1ad   : > { %1335 = vmatprep.mubr.bf16.mxu0 %v540_v58 }
 0x1ae   : > { %1336 = vmatmul.mubr.bf16.gmra.mxu0 %v541_v59 }
 0x1af   : > { %1368 = vmatpush3.bf16.msra.mxu0 %v1420_v3 }
 0x266   : > { %v1333_v5 = vpop.f32.mrf.mxu0 }
 0x267   : > { %v656_v6 = vadd.f32 %v1333_v5, %v1166_v4  ;;  %v1422_v5 = vld [vmem:[%s1671_s6 + $0x18] sm:$0xff]  }
 0x268   : > { %v647_v7 = vpop.f32.mrf.mxu0 }
 0x269   : > { %v1177_v8 = vmul.f32 -1.442695, %v656_v6  ;;  %v648_v9 = vadd.f32 %v1166_v4, %v647_v7  ;;  %v1424_v7 = vld [vmem:[%s1671_s6 + $0x8] sm:$0xff]  }
 0x26a   : > { %v1334_v10 = vpop.f32.mrf.mxu0 }
 0x26b   : > { %v1175_v11 = vmul.f32 -1.442695, %v648_v9  ;;  %v659_v12 = vadd.f32 %v1334_v10, %v1166_v4  ;;  %1426 = vpow2.f32 %v1177_v8  ;;  %v1425_v8 = vld [vmem:[%s1671_s6] sm:$0xff]  }
 0x26c   : > { %v650_v13 = vpop.f32.mrf.mxu0 }
 0x26d   : > { %1428 = vpow2.f32 %v1175_v11  ;;  %v1178_v14 = vmul.f32 -1.442695, %v659_v12  ;;  %v651_v15 = vadd.f32 %v1166_v4, %v650_v13 }
 0x26e   : > { %v1337_v16 = vpop.f32.mrf.mxu0 }
 0x26f   : > { %1430 = vpow2.f32 %v1178_v14  ;;  %v1176_v17 = vmul.f32 -1.442695, %v651_v15  ;;  %v672_v18 = vadd.f32 %v1337_v16, %v1166_v4 }
 0x270   : > { %v663_v19 = vpop.f32.mrf.mxu0 }
 0x271   : > { %1432 = vpow2.f32 %v1176_v17  ;;  %v1181_v20 = vmul.f32 -1.442695, %v672_v18  ;;  %v664_v21 = vadd.f32 %v1166_v4, %v663_v19 }
 0x272   : > { %v1338_v22 = vpop.f32.mrf.mxu0 }
 0x273   : > { %v1179_v23 = vmul.f32 -1.442695, %v664_v21  ;;  %v675_v24 = vadd.f32 %v1338_v22, %v1166_v4  ;;  %1434 = vpow2.f32 %v1181_v20 }
 0x274   : > { %v666_v25 = vpop.f32.mrf.mxu0 }
 0x275   : > { %1436 = vpow2.f32 %v1179_v23  ;;  %v1182_v26 = vmul.f32 -1.442695, %v675_v24  ;;  %v667_v27 = vadd.f32 %v1166_v4, %v666_v25  ;;  %v1421_v4 = vld [vmem:[%s1671_s6 + $0x20] sm:$0xff]  }
 0x276   : > { %1369 = vmatprep.subr.bf16.mxu0 %v1421_v4 }
 0x277   : > { %1438 = vpow2.f32 %v1182_v26  ;;  %v1180_v28 = vmul.f32 -1.442695, %v667_v27  ;;  %1370 = vmatpush3.bf16.msra.mxu0 %v1421_v4 }
 0x278   : > { %v1427_v29 = vpop.eup %1426  ;;  %1371 = vmatprep.subr.bf16.mxu0 %v1422_v5 }
 0x279   : > { %1440 = vpow2.f32 %v1180_v28  ;;  %v704_v33 = vadd.f32 1.0, %v1427_v29 }
 0x27a   : > { %v1429_v30 = vpop.eup %1428 }
 0x27b   : > { %v702_v31 = vadd.f32 1.0, %v1429_v30  ;;  %1372 = vmatpush3.bf16.msra.mxu0 %v1422_v5 }
 0x27c   : > { %v1431_v32 = vpop.eup %1430 }
 0x27d   : > { %v705_v34 = vadd.f32 1.0, %v1431_v32  ;;  %1442 = vrcp.f32 %v702_v31 }
 0x27e   : > { %v1433_v35 = vpop.eup %1432 }
 0x27f   : > { %1444 = vrcp.f32 %v705_v34  ;;  %v703_v36 = vadd.f32 1.0, %v1433_v35 }
 0x280   : > { %1446 = vrcp.f32 %v704_v33  ;;  %v1435_v37 = vpop.eup %1434 }
 0x281   : > { %1448 = vrcp.f32 %v703_v36  ;;  %v708_v41 = vadd.f32 1.0, %v1435_v37 }
 0x282   : > { %v1437_v38 = vpop.eup %1436 }
 0x283   : > { %v706_v39 = vadd.f32 1.0, %v1437_v38 }
 0x284   : > { %v1439_v40 = vpop.eup %1438 }
 0x285   : > { %v709_v42 = vadd.f32 1.0, %v1439_v40  ;;  %1450 = vrcp.f32 %v706_v39 }
 0x286   : > { %v1441_v43 = vpop.eup %1440 }
 0x287   : > { %1452 = vrcp.f32 %v709_v42  ;;  %v707_v44 = vadd.f32 1.0, %v1441_v43 }
 0x288   : > { %1454 = vrcp.f32 %v708_v41 }
 0x289   : > { %1456 = vrcp.f32 %v707_v44 }
 0x28a   : > { %v1443_v45 = vpop.eup %1442 }
 0x28b   : > { %v726_v50 = vmul.f32 %v1443_v45, %v648_v9  ;;  %v1200_v9 = vld [vmem:[%s1670_s5 + $0x1] ss:$0 sm:$0xff] }
 0x28c   : > { %v1445_v46 = vpop.eup %1444 }
 0x28d   : > { %v1447_v47 = vpop.eup %1446  ;;  %v729_v49 = vmul.f32 %v1445_v46, %v659_v12 }
 0x28e   : > { %v1449_v48 = vpop.eup %1448  ;;  %v728_v52 = vmul.f32 %v1447_v47, %v656_v6  ;;  %v1423_v6 = vld [vmem:[%s1671_s6 + $0x10] sm:$0xff]  }
 0x28f   : > { %v727_v51 = vmul.f32 %v1449_v48, %v651_v15  ;;  %1373 = vmatprep.subr.bf16.mxu0 %v1423_v6 }
 0x290   : > { %v735_v54 = vpack.c.bf16 %v729_v49, %v728_v52  ;;  %1374 = vmatpush3.bf16.msra.mxu0 %v1423_v6 }
 0x291   : > { %v734_v53 = vpack.c.bf16 %v727_v51, %v726_v50  ;;  %1375 = vmatprep.subr.bf16.mxu0 %v1424_v7 }
 0x292   : > { %v1451_v55 = vpop.eup %1450 }
 0x293   : > { %1355 = vmatprep.mubr.bf16.mxu1 %v734_v53  ;;  %v730_v60 = vmul.f32 %v1451_v55, %v664_v21 }
 0x294   : > { %v1453_v56 = vpop.eup %1452  ;;  %1356 = vmatmul.mubr.bf16.vlgmr.msra.gmra.mxu1 %v735_v54  ;;  %1376 = vmatpush3.bf16.msra.mxu0 %v1424_v7 }
 0x295   : > { %v1455_v57 = vpop.eup %1454  ;;  %v733_v59 = vmul.f32 %v1453_v56, %v675_v24  ;;  %1377 = vmatprep.subr.bf16.mxu0 %v1425_v8 }
 0x296   : > { %v1457_v58 = vpop.eup %1456  ;;  %v732_v62 = vmul.f32 %v1455_v57, %v672_v18 }
 0x297   : > { %v731_v61 = vmul.f32 %v1457_v58, %v667_v27 }
 0x298   : > { %v737_v0 = vpack.c.bf16 %v733_v59, %v732_v62  ;;  %1378 = vmatpush3.bf16.msra.mxu0 %v1425_v8 }
 0x299   : > { %v736_v63 = vpack.c.bf16 %v731_v61, %v730_v60 }
 0x29b   : > { %1359 = vmatprep.mubr.bf16.mxu1 %v736_v63 }
 0x29c   : > { %1360 = vmatmul.mubr.bf16.gmra.mxu1 %v737_v0 }
 0x354   : > { %v1357_v10 = vpop.f32.mrf.mxu1 }
 0x355   : > { %v854_v11 = vadd.f32 %v1357_v10, %v1200_v9 }
 0x356   : > { %v845_v12 = vpop.f32.mrf.mxu1 }
 0x357   : > { %v1211_v13 = vmul.f32 -1.442695, %v854_v11  ;;  %v846_v14 = vadd.f32 %v1200_v9, %v845_v12 }
 0x358   : > { %v1358_v15 = vpop.f32.mrf.mxu1 }
 0x359   : > { %v1209_v16 = vmul.f32 -1.442695, %v846_v14  ;;  %v857_v17 = vadd.f32 %v1358_v15, %v1200_v9  ;;  %1458 = vpow2.f32 %v1211_v13 }
 0x35a   : > { %v848_v18 = vpop.f32.mrf.mxu1 }
 0x35b   : > { %1460 = vpow2.f32 %v1209_v16  ;;  %v1212_v19 = vmul.f32 -1.442695, %v857_v17  ;;  %v849_v20 = vadd.f32 %v1200_v9, %v848_v18 }
 0x35c   : > { %v1361_v21 = vpop.f32.mrf.mxu1 }
 0x35d   : > { %1462 = vpow2.f32 %v1212_v19  ;;  %v1210_v22 = vmul.f32 -1.442695, %v849_v20  ;;  %v870_v23 = vadd.f32 %v1361_v21, %v1200_v9 }
 0x35e   : > { %v861_v24 = vpop.f32.mrf.mxu1 }
 0x35f   : > { %1464 = vpow2.f32 %v1210_v22  ;;  %v1215_v25 = vmul.f32 -1.442695, %v870_v23  ;;  %v862_v26 = vadd.f32 %v1200_v9, %v861_v24 }
 0x360   : > { %v1362_v27 = vpop.f32.mrf.mxu1 }
 0x361   : > { %v1213_v28 = vmul.f32 -1.442695, %v862_v26  ;;  %v873_v29 = vadd.f32 %v1362_v27, %v1200_v9  ;;  %1466 = vpow2.f32 %v1215_v25 }
 0x362   : > { %v864_v30 = vpop.f32.mrf.mxu1 }
 0x363   : > { %1468 = vpow2.f32 %v1213_v28  ;;  %v1216_v31 = vmul.f32 -1.442695, %v873_v29  ;;  %v865_v32 = vadd.f32 %v1200_v9, %v864_v30 }
 0x365   : > { %1470 = vpow2.f32 %v1216_v31  ;;  %v1214_v33 = vmul.f32 -1.442695, %v865_v32 }
 0x366   : > { %v1459_v34 = vpop.eup %1458 }
 0x367   : > { %1472 = vpow2.f32 %v1214_v33  ;;  %v902_v38 = vadd.f32 1.0, %v1459_v34 }
 0x368   : > { %v1461_v35 = vpop.eup %1460 }
 0x369   : > { %v900_v36 = vadd.f32 1.0, %v1461_v35 }
 0x36a   : > { %v1463_v37 = vpop.eup %1462 }
 0x36b   : > { %v903_v39 = vadd.f32 1.0, %v1463_v37  ;;  %1474 = vrcp.f32 %v900_v36 }
 0x36c   : > { %v1465_v40 = vpop.eup %1464 }
 0x36d   : > { %1476 = vrcp.f32 %v903_v39  ;;  %v901_v41 = vadd.f32 1.0, %v1465_v40 }
 0x36e   : > { %1478 = vrcp.f32 %v902_v38  ;;  %v1467_v42 = vpop.eup %1466 }
 0x36f   : > { %1480 = vrcp.f32 %v901_v41  ;;  %v906_v46 = vadd.f32 1.0, %v1467_v42 }
 0x370   : > { %v1469_v43 = vpop.eup %1468 }
 0x371   : > { %v904_v44 = vadd.f32 1.0, %v1469_v43 }
 0x372   : > { %v1471_v45 = vpop.eup %1470 }
 0x373   : > { %v907_v47 = vadd.f32 1.0, %v1471_v45  ;;  %1482 = vrcp.f32 %v904_v44 }
 0x374   : > { %v1473_v48 = vpop.eup %1472 }
 0x375   : > { %1484 = vrcp.f32 %v907_v47  ;;  %v905_v49 = vadd.f32 1.0, %v1473_v48 }
 0x376   : > { %1486 = vrcp.f32 %v906_v46 }
 0x377   : > { %1488 = vrcp.f32 %v905_v49 }
 0x378   : > { %v1475_v50 = vpop.eup %1474 }
 0x379   : > { %v924_v55 = vmul.f32 %v1475_v50, %v846_v14 }
 0x37a   : > { %v1477_v51 = vpop.eup %1476 }
 0x37b   : > { %v1479_v52 = vpop.eup %1478  ;;  %v927_v54 = vmul.f32 %v1477_v51, %v857_v17 }
 0x37c   : > { %v1481_v53 = vpop.eup %1480  ;;  %v926_v57 = vmul.f32 %v1479_v52, %v854_v11 }
 0x37d   : > { %v925_v56 = vmul.f32 %v1481_v53, %v849_v20 }
 0x37e   : > { %v933_v59 = vpack.c.bf16 %v927_v54, %v926_v57 }
 0x37f   : > { %v932_v58 = vpack.c.bf16 %v925_v56, %v924_v55 }
 0x380   : > { %v1483_v60 = vpop.eup %1482 }
 0x381   : > { %1379 = vmatprep.mubr.bf16.mxu0 %v932_v58  ;;  %v928_v1 = vmul.f32 %v1483_v60, %v862_v26 }
 0x382   : > { %v1485_v61 = vpop.eup %1484  ;;  %1380 = vmatmul.mubr.bf16.vlgmr.msra.gmra.mxu0 %v933_v59 }
 0x383   : > { %v1487_v62 = vpop.eup %1486  ;;  %v931_v0 = vmul.f32 %v1485_v61, %v873_v29 }
 0x384   : > { %v1489_v63 = vpop.eup %1488  ;;  %v930_v3 = vmul.f32 %v1487_v62, %v870_v23 }
 0x385   : > { %v929_v2 = vmul.f32 %v1489_v63, %v865_v32 }
 0x386   : > { %v935_v5 = vpack.c.bf16 %v931_v0, %v930_v3 }
 0x387   : > { %v934_v4 = vpack.c.bf16 %v929_v2, %v928_v1 }
 0x389   : > { %1383 = vmatprep.mubr.bf16.mxu0 %v934_v4 }
 0x38a   : > { %1384 = vmatmul.mubr.bf16.gmra.mxu0 %v935_v5 }
 0x442   : > { %v1381_v6 = vpop.f32.mrf.mxu0 }
 0x443   : > { %1067 = vst.msk [vmem:[%s302_s9 + $0x10] sm:$0xff] %vm460_vm2, %v1381_v6 }
 0x444   : > { %v1034_v7 = vpop.f32.mrf.mxu0 }
 0x445   : > { %1065 = vst.msk [vmem:[%s302_s9] sm:$0xff] %vm460_vm2, %v1034_v7 }
 0x446   : > { %v1382_v8 = vpop.f32.mrf.mxu0 }
 0x447   : > { %1068 = vst.msk [vmem:[%s302_s9 + $0x18] sm:$0xff] %vm460_vm2, %v1382_v8 }
 0x448   : > { %v1037_v9 = vpop.f32.mrf.mxu0 }
 0x449   : > { %1066 = vst.msk [vmem:[%s302_s9 + $0x8] sm:$0xff] %vm460_vm2, %v1037_v9 }
 0x44a   : > { %v1385_v10 = vpop.f32.mrf.mxu0 }
 0x44b   : > { %1071 = vst.msk [vmem:[%s302_s9 + $0x30] sm:$0xff] %vm460_vm2, %v1385_v10 }
 0x44c   : > { %v1050_v11 = vpop.f32.mrf.mxu0 }
 0x44d   : > { %1069 = vst.msk [vmem:[%s302_s9 + $0x20] sm:$0xff] %vm460_vm2, %v1050_v11 }
 0x44e   : > { %v1386_v12 = vpop.f32.mrf.mxu0 }
 0x44f   : > { %1072 = vst.msk [vmem:[%s302_s9 + $0x38] sm:$0xff] %vm460_vm2, %v1386_v12 }
 0x450   : > { %v1053_v13 = vpop.f32.mrf.mxu0 }
 0x451   : > { %1070 = vst.msk [vmem:[%s302_s9 + $0x28] sm:$0xff] %vm460_vm2, %v1053_v13 }
 0x452 PF: > { %s17_s24 = sadd.s32 1, %s1496_s24  }
 0x453   : > { %p14_p4 = scmp.ge.s32.totalorder %s17_s24, 4  }
 0x455   :  { %16 = sbr.rel (!%p14_p4) target bundleno = 1 (0x1), region = 83 }

</bundles_post_ra>
